<compile_context>
chip_gen: v5e
topology: v5e:2x2
jax: 0.10.0
libtpu: 0.0.40
codegen_flags: <defaults>
</compile_context>

<pallas_src>
import jax
import jax.numpy as jnp
from jax import lax
from jax.experimental import pallas as pl
from jax.experimental.pallas import tpu as pltpu

_LANES = 128
_SUBLANES = 8
_ROW_ALIGN = 32          # int8 native sublane tile; also covers f32 (8) / bf16 (16)


def _round_up(x, m):
    return ((x + m - 1) // m) * m


def _make_kernel(arr_rows, tile_rows, tiles_per_chunk, ragged):
    """Smooth-L1 partial sums, accumulated into the chunk's (8,128) out block."""

    def kernel(p_ref, t_ref, m_ref, out_ref):
        i = pl.program_id(1)          # tile index within this chunk ("arbitrary")

        @pl.when(i == 0)
        def _init():
            out_ref[...] = jnp.zeros_like(out_ref)

        p = p_ref[...].astype(jnp.float32)          # (tile_rows, 128)
        t = t_ref[...].astype(jnp.float32)
        m = m_ref[...].astype(jnp.float32)          # int8 {0,1} -> f32

        x = (p - t) * m                             # == pred*m - target*m (exact)
        ax = jnp.abs(x)
        c = jnp.minimum(ax, 1.0)
        elem = c * (ax - 0.5 * c)                   # smooth_l1, beta=1

        if ragged:
            # The grid overhangs the array: rows past `arr_rows` in the last
            # tile hold undefined data -> zero them before accumulating.
            tile0 = (pl.program_id(0) * tiles_per_chunk + i) * tile_rows
            row_ids = lax.broadcasted_iota(jnp.int32, (tile_rows, _LANES), 0)
            elem = jnp.where(tile0 + row_ids < arr_rows, elem, 0.0)

        # Sublane-aligned fold: pure VPU vreg adds into one (8,128) partial.
        out_ref[...] += elem.reshape(
            tile_rows // _SUBLANES, _SUBLANES, _LANES).sum(axis=0)

    return kernel


def kd_reg_loss(pred, target, mask, *, max_tile_rows=8192, num_chunks=2):
    """pred, target: (B, N, D) (f32 or bf16); mask: (B, N) of 0/1. Scalar f32."""
    B, N, D = pred.shape
    total = B * N * D

    # num = mask.float().sum()  -- tiny (B, N) reduce, done wrapper-side.
    num = jnp.sum(mask.astype(jnp.float32))

    # Expanded 0/1 mask shipped as int8 (exact; 4x fewer HBM bytes than f32).
    mask_i8 = jnp.broadcast_to((mask != 0).astype(jnp.int8)[:, :, None], (B, N, D))

    rows = pl.cdiv(total, _LANES)
    arr_rows = _round_up(rows, _ROW_ALIGN)
    pad = arr_rows * _LANES - total     # tail alignment only, never tile-multiples

    def _flat(x):
        x = x.reshape(-1)
        if pad:
            # Zero tail is exact (diff = 0, mask = 0).  Skipped whenever
            # total % 4096 == 0 (e.g. the usual (B, 128, 2) CenterNet shapes).
            x = jnp.pad(x, (0, pad))
        return x.reshape(arr_rows, _LANES)

    p2, t2, m2 = _flat(pred), _flat(target), _flat(mask_i8)

    tile_rows = min(arr_rows,
                    max(_ROW_ALIGN, (max_tile_rows // _ROW_ALIGN) * _ROW_ALIGN))
    n_tiles = pl.cdiv(arr_rows, tile_rows)
    n_chunks = min(num_chunks, n_tiles)          # one chunk per TensorCore (v7x: 2)
    tiles_per_chunk = pl.cdiv(n_tiles, n_chunks)
    ragged = (n_chunks * tiles_per_chunk * tile_rows) != arr_rows

    def in_map(c, i):
        # Clamp so an over-running last chunk never addresses a block past the
        # array; its rows are zeroed by the in-kernel validity mask.
        return (jnp.minimum(c * tiles_per_chunk + i, n_tiles - 1), 0)

    block = pl.BlockSpec((tile_rows, _LANES), in_map)
    kernel = _make_kernel(arr_rows, tile_rows, tiles_per_chunk, ragged)

    partials = pl.pallas_call(
        kernel,
        out_shape=jax.ShapeDtypeStruct((n_chunks * _SUBLANES, _LANES), jnp.float32),
        grid=(n_chunks, tiles_per_chunk),
        in_specs=[block, block, block],
        out_specs=pl.BlockSpec((_SUBLANES, _LANES), lambda c, i: (c, 0)),
        compiler_params=pltpu.CompilerParams(
            dimension_semantics=("parallel", "arbitrary"),
            # 2 x (4 + 4 + 1) MiB of double-buffered streams at the default
            # 8192-row tile plus elementwise temporaries; also lifts v5e's
            # 16-MiB default scoped-VMEM limit (physical VMEM: 128/128/64 MiB).
            vmem_limit_bytes=48 * 1024 * 1024,
        ),
    )(p2, t2, m2)

    return jnp.sum(partials) / (num + 0.0001)


def _reference(pred, target, mask):
    pred = pred.astype(jnp.float32)
    target = target.astype(jnp.float32)
    m = mask.astype(jnp.float32)
    num = jnp.sum(m)
    x = pred * m[:, :, None] - target * m[:, :, None]
    ax = jnp.abs(x)
    elem = jnp.where(ax < 1.0, 0.5 * x * x, ax - 0.5)
    return jnp.sum(elem) / (num + 0.0001)


if __name__ == "__main__":
    # 1) Small CenterNet-like shape (wh/offset regression: D=2).
    B, N, D = 2, 8, 2
    k1, k2, k3 = jax.random.split(jax.random.PRNGKey(0), 3)
    pred = jax.random.normal(k1, (B, N, D), dtype=jnp.float32) * 2.0
    target = jax.random.normal(k2, (B, N, D), dtype=jnp.float32) * 2.0
    mask = (jax.random.uniform(k3, (B, N)) > 0.5).astype(jnp.float32)

    loss = kd_reg_loss(pred, target, mask)
    jax.block_until_ready(loss)
    ref = _reference(pred, target, mask)
    assert jnp.allclose(loss, ref, rtol=1e-5, atol=1e-6), (loss, ref)

    # 2) Multi-tile + 2-chunk + ragged-last-block + tail-pad path.
    B2, N2, D2 = 2, 3000, 2
    k4, k5, k6 = jax.random.split(jax.random.PRNGKey(1), 3)
    pred2 = jax.random.normal(k4, (B2, N2, D2), dtype=jnp.float32) * 2.0
    target2 = jax.random.normal(k5, (B2, N2, D2), dtype=jnp.float32) * 2.0
    mask2 = (jax.random.uniform(k6, (B2, N2)) > 0.5).astype(jnp.float32)

    loss2 = kd_reg_loss(pred2, target2, mask2, max_tile_rows=64)
    jax.block_until_ready(loss2)
    ref2 = _reference(pred2, target2, mask2)
    assert jnp.allclose(loss2, ref2, rtol=1e-4, atol=1e-5), (loss2, ref2)

    # 3) bf16 pred/target (halves the two dominant HBM streams; f32 compute).
    B3, N3, D3 = 2, 128, 2
    k7, k8, k9 = jax.random.split(jax.random.PRNGKey(2), 3)
    pred3 = (jax.random.normal(k7, (B3, N3, D3), dtype=jnp.float32) * 2.0
             ).astype(jnp.bfloat16)
    target3 = (jax.random.normal(k8, (B3, N3, D3), dtype=jnp.float32) * 2.0
               ).astype(jnp.bfloat16)
    mask3 = (jax.random.uniform(k9, (B3, N3)) > 0.5).astype(jnp.float32)

    loss3 = kd_reg_loss(pred3, target3, mask3)
    jax.block_until_ready(loss3)
    ref3 = _reference(pred3, target3, mask3)   # reference upcasts the same bf16 values
    assert jnp.allclose(loss3, ref3, rtol=1e-4, atol=1e-5), (loss3, ref3)

    print("KERNEL_OK")
</pallas_src>

<mosaic_0001>
module attributes {stable_mosaic.version = 11 : i64} {
  func.func @kernel(%arg0: i32, %arg1: i32, %arg2: memref<32x128xf32, #tpu.memory_space<vmem>>, %arg3: memref<32x128xf32, #tpu.memory_space<vmem>>, %arg4: memref<32x128xi8, #tpu.memory_space<vmem>>, %arg5: memref<8x128xf32, #tpu.memory_space<vmem>>) attributes {dimension_semantics = [#tpu.dimension_semantics<parallel>, #tpu.dimension_semantics<arbitrary>], iteration_bounds = array<i64: 1, 1>, scalar_prefetch = 0 : i64, scratch_operands = 0 : i64, tpu.core_type = #tpu.core_type<tc>, window_params = [{transform_indices = @transform_0, window_bounds = array<i64: 32, 128>}, {transform_indices = @transform_1, window_bounds = array<i64: 32, 128>}, {transform_indices = @transform_2, window_bounds = array<i64: 32, 128>}, {transform_indices = @transform_3, window_bounds = array<i64: 8, 128>}]} {
    %c0_i32 = arith.constant 0 : i32
    %0 = arith.cmpi eq, %arg1, %c0_i32 : i32
    %1 = arith.extui %0 : i1 to i32
    %c0_i32_0 = arith.constant 0 : i32
    %2 = arith.cmpi ne, %1, %c0_i32_0 : i32
    scf.if %2 {
      %cst_12 = arith.constant 0.000000e+00 : f32
      %21 = vector.broadcast %cst_12 : f32 to vector<8x128xf32>
      %c0_13 = arith.constant 0 : index
      %c0_14 = arith.constant 0 : index
      %22 = vector.load %arg5[%c0_13, %c0_14] : memref<8x128xf32, #tpu.memory_space<vmem>>, vector<8x128xf32>
      tpu.vector_store %arg5[%c0_13, %c0_14], %21 {strides = array<i32>} : memref<8x128xf32, #tpu.memory_space<vmem>>, vector<8x128xf32>,
    } else {
    }
    %c0 = arith.constant 0 : index
    %c0_1 = arith.constant 0 : index
    %3 = vector.load %arg2[%c0, %c0_1] : memref<32x128xf32, #tpu.memory_space<vmem>>, vector<32x128xf32>
    %c0_2 = arith.constant 0 : index
    %c0_3 = arith.constant 0 : index
    %4 = vector.load %arg3[%c0_2, %c0_3] : memref<32x128xf32, #tpu.memory_space<vmem>>, vector<32x128xf32>
    %c0_4 = arith.constant 0 : index
    %c0_5 = arith.constant 0 : index
    %5 = vector.load %arg4[%c0_4, %c0_5] : memref<32x128xi8, #tpu.memory_space<vmem>>, vector<32x128xi8>
    %6 = arith.sitofp %5 : vector<32x128xi8> to vector<32x128xf32>
    %7 = arith.subf %3, %4 : vector<32x128xf32>
    %8 = arith.mulf %7, %6 : vector<32x128xf32>
    %9 = math.absf %8 : vector<32x128xf32>
    %cst = arith.constant 1.000000e+00 : f32
    %10 = vector.broadcast %cst : f32 to vector<32x128xf32>
    %11 = arith.minimumf %9, %10 : vector<32x128xf32>
    %cst_6 = arith.constant 5.000000e-01 : f32
    %12 = vector.broadcast %cst_6 : f32 to vector<32x128xf32>
    %13 = arith.mulf %12, %11 : vector<32x128xf32>
    %14 = arith.subf %9, %13 : vector<32x128xf32>
    %15 = arith.mulf %11, %14 : vector<32x128xf32>
    %c0_7 = arith.constant 0 : index
    %c0_8 = arith.constant 0 : index
    %16 = vector.load %arg5[%c0_7, %c0_8] : memref<8x128xf32, #tpu.memory_space<vmem>>, vector<8x128xf32>
    %17 = vector.shape_cast %15 : vector<32x128xf32> to vector<4x8x128xf32>
    %cst_9 = arith.constant dense<0.000000e+00> : vector<8x128xf32>
    %18 = vector.multi_reduction <add>, %17, %cst_9 [0] : vector<4x8x128xf32> to vector<8x128xf32>
    %19 = arith.addf %16, %18 : vector<8x128xf32>
    %c0_10 = arith.constant 0 : index
    %c0_11 = arith.constant 0 : index
    %20 = vector.load %arg5[%c0_10, %c0_11] : memref<8x128xf32, #tpu.memory_space<vmem>>, vector<8x128xf32>
    tpu.vector_store %arg5[%c0_10, %c0_11], %19 {strides = array<i32>} : memref<8x128xf32, #tpu.memory_space<vmem>>, vector<8x128xf32>,
    return
  }
  func.func @transform_0(%arg0: i32, %arg1: i32) -> (i32, i32) {
    %c1_i32 = arith.constant 1 : i32
    %0 = arith.muli %arg0, %c1_i32 : i32
    %1 = arith.addi %0, %arg1 : i32
    %c0_i32 = arith.constant 0 : i32
    %2 = arith.minsi %1, %c0_i32 : i32
    %c0_i32_0 = arith.constant 0 : i32
    %c0_i32_1 = arith.constant 0 : i32
    return %2, %c0_i32_0 : i32, i32
  }
  func.func @transform_1(%arg0: i32, %arg1: i32) -> (i32, i32) {
    %c1_i32 = arith.constant 1 : i32
    %0 = arith.muli %arg0, %c1_i32 : i32
    %1 = arith.addi %0, %arg1 : i32
    %c0_i32 = arith.constant 0 : i32
    %2 = arith.minsi %1, %c0_i32 : i32
    %c0_i32_0 = arith.constant 0 : i32
    %c0_i32_1 = arith.constant 0 : i32
    return %2, %c0_i32_0 : i32, i32
  }
  func.func @transform_2(%arg0: i32, %arg1: i32) -> (i32, i32) {
    %c1_i32 = arith.constant 1 : i32
    %0 = arith.muli %arg0, %c1_i32 : i32
    %1 = arith.addi %0, %arg1 : i32
    %c0_i32 = arith.constant 0 : i32
    %2 = arith.minsi %1, %c0_i32 : i32
    %c0_i32_0 = arith.constant 0 : i32
    %c0_i32_1 = arith.constant 0 : i32
    return %2, %c0_i32_0 : i32, i32
  }
  func.func @transform_3(%arg0: i32, %arg1: i32) -> (i32, i32) {
    %c0_i32 = arith.constant 0 : i32
    %c0_i32_0 = arith.constant 0 : i32
    return %arg0, %c0_i32 : i32, i32
  }
}

</mosaic_0001>

<bundles_post_ra>
// kernel: tpu_custom_call.1
= control target key start
LH: loop header
LB: loop body
LE: loop exit
PB: predicated region body
PF: predicated region fallthrough
CT: control target
= control target key end

     0   :  { %8 = vsyncpa [#allocation3], 0  ;;  %s315_s0 = inlined_call_operand.hbm [shape: f32[32,128], index: 0, kind: input, shape index: {}]   ;;  %s316_s1 = inlined_call_operand.hbm [shape: f32[32,128], index: 1, kind: input, shape index: {}]   ;;  %s317_s2 = inlined_call_operand.hbm [shape: s8[32,128], index: 2, kind: input, shape index: {}]   ;;  %s318_s3 = inlined_call_operand.hbm [shape: f32[8,128], index: 3, kind: output, shape index: {}]  }
   0x1   :  { %9 = vsyncpa [#allocation6], 0 }
   0x2   :  { %10 = vsyncpa [#allocation4], 0  ;;  %s40_s14 = sshll.u32 %s316_s1, 4  ;;  %s277_s15 = smov [#allocation5]   ;;  %s41_s14 = int_to_ptr.hbm [resolvable:$true] %s40_s14 }
   0x3   :  { %s42_s16 = sshll.u32 %s277_s15, 4  ;;  %s21_s19 = sshll.u32 %s315_s0, 4  ;;  %s43_s16 = int_to_ptr.vmem [resolvable:$true] %s42_s16  ;;  %s22_s19 = int_to_ptr.hbm [resolvable:$true] %s21_s19 }
   0x4   :  { %s278_s20 = smov 128   ;;  %s279_s21 = smov 8  }
   0x5   :  { %48 = dma.hbm_to_vmem [thread:$0]  %s41_s14, 512, %s43_s16, [#allocation6], %s278_s20, %s278_s20, %s279_s21  }
   0x6   :  { %s280_s22 = smov [#allocation2]   ;;  %s59_s26 = sshll.u32 %s317_s2, 4  ;;  %s60_s26 = int_to_ptr.hbm [resolvable:$true] %s59_s26 }
   0x7   :  { %s23_s23 = sshll.u32 %s280_s22, 4  ;;  %s281_s1 = smov [#allocation7]   ;;  %s24_s23 = int_to_ptr.vmem [resolvable:$true] %s23_s23 }
   0x8   :  { %29 = dma.hbm_to_vmem [thread:$0]  %s22_s19, 512, %s24_s23, [#allocation3], %s278_s20, %s278_s20, %s279_s21  }
   0x9   :  { %s61_s27 = sshll.u32 %s281_s1, 4  ;;  %s62_s27 = int_to_ptr.vmem [resolvable:$true] %s61_s27 }
   0xa   :  { %64 = dma.hbm_to_vmem [thread:$0]  %s60_s26, 128, %s62_s27, [#allocation6]  }
   0xb   :  { %271 = dma.done.wait [#allocation3], 512  }
   0xc   :  { %272 = vsyncadd [#allocation3], 4294966784 }
   0xd   :  { %273 = dma.done.wait [#allocation6], 640  }
   0xe   :  { %274 = vsyncadd [#allocation6], 4294966656  ;;  %v93_v0 = vld [vmem:[#allocation2] sm:$0xff]  ;;  %v94_v1 = vld [vmem:[#allocation2 + $0x8] sm:$0xff]  ;;  %s282_s0 = smov [#allocation8]   ;;  %s151_s30 = sshll.u32 %s318_s3, 4  ;;  %s152_s30 = int_to_ptr.hbm [resolvable:$true] %s151_s30 }
   0xf   :  { %v95_v2 = vld [vmem:[#allocation2 + $0x10] sm:$0xff]  ;;  %v96_v3 = vld [vmem:[#allocation2 + $0x18] sm:$0xff]  ;;  %v97_v4 = vld [vmem:[#allocation5] sm:$0xff]  ;;  %s149_s2 = sshll.u32 %s282_s0, 4  ;;  %s150_s2 = int_to_ptr.vmem [resolvable:$true] %s149_s2 }
  0x10   :  { %v98_v5 = vld [vmem:[#allocation5 + $0x8] sm:$0xff]  ;;  %v99_v6 = vld [vmem:[#allocation5 + $0x10] sm:$0xff]  ;;  %v100_v7 = vld [vmem:[#allocation5 + $0x18] sm:$0xff]  ;;  %v110_v9 = vsub.f32 %v93_v0, %v97_v4 }
  0x11   :  { %v101_v8 = vld [vmem:[#allocation7] sm:$0xff]  ;;  %v111_v10 = vsub.f32 %v94_v1, %v98_v5  ;;  %v112_v15 = vsub.f32 %v95_v2, %v99_v6  ;;  %v113_v16 = vsub.f32 %v96_v3, %v100_v7 }
  0x12   :  { %v102_v11 = vunpack.c.0.s8 %v101_v8  ;;  %v103_v12 = vunpack.c.1.s8 %v101_v8  ;;  %v104_v13 = vunpack.c.2.s8 %v101_v8  ;;  %v105_v14 = vunpack.c.3.s8 %v101_v8 }
  0x14   :  { %v106_v17 = vcvt.s32.f32 %v102_v11  ;;  %v107_v18 = vcvt.s32.f32 %v103_v12  ;;  %v108_v19 = vcvt.s32.f32 %v104_v13  ;;  %v109_v20 = vcvt.s32.f32 %v105_v14 }
  0x16   :  { %v114_v21 = vmul.f32 %v110_v9, %v106_v17  ;;  %v115_v22 = vmul.f32 %v111_v10, %v107_v18  ;;  %v116_v23 = vmul.f32 %v112_v15, %v108_v19  ;;  %v117_v24 = vmul.f32 %v113_v16, %v109_v20 }
  0x18   :  { %v118_v25 = vand.u32 2147483647, %v114_v21  ;;  %v119_v26 = vand.u32 2147483647, %v115_v22  ;;  %v120_v27 = vand.u32 2147483647, %v116_v23 }
  0x19   :  { %v121_v28 = vand.u32 2147483647, %v117_v24 }
  0x1a   :  { %v122_v29 = vmin.f32 %v118_v25, 1.0  ;;  %v123_v30 = vmin.f32 %v119_v26, 1.0  ;;  %v124_v31 = vmin.f32 %v120_v27, 1.0 }
  0x1b   :  { %v125_v32 = vmin.f32 %v121_v28, 1.0 }
  0x1c   :  { %v126_v33 = vmul.f32 0.5, %v122_v29  ;;  %v127_v34 = vmul.f32 0.5, %v123_v30  ;;  %v128_v35 = vmul.f32 0.5, %v124_v31 }
  0x1d   :  { %v129_v36 = vmul.f32 0.5, %v125_v32 }
  0x1e   :  { %v130_v37 = vsub.f32 %v118_v25, %v126_v33  ;;  %v131_v38 = vsub.f32 %v119_v26, %v127_v34  ;;  %v132_v39 = vsub.f32 %v120_v27, %v128_v35 }
  0x1f   :  { %v133_v40 = vsub.f32 %v121_v28, %v129_v36 }
  0x20   :  { %v134_v41 = vmul.f32 %v130_v37, %v122_v29  ;;  %v135_v42 = vmul.f32 %v131_v38, %v123_v30  ;;  %v136_v43 = vmul.f32 %v132_v39, %v124_v31 }
  0x21   :  { %v137_v44 = vmul.f32 %v133_v40, %v125_v32 }
  0x22   :  { %v139_v45 = vadd.f32 %v135_v42, %v134_v41 }
  0x24   :  { %v140_v46 = vadd.f32 %v139_v45, %v136_v43 }
  0x26   :  { %v141_v47 = vadd.f32 %v140_v46, %v137_v44 }
  0x28   :  { %143 = vst [vmem:[#allocation8] sm:$0xff] %v141_v47 }
  0x29   :  { %154 = dma.vmem_to_hbm [thread:$0]  %s150_s2, 128, %s152_s30, [#allocation4]  }
  0x2a   :  { %275 = dma.done.wait [#allocation4], 128  }
  0x2b   :  { %276 = vsyncadd [#allocation4], 4294967168 }
  0x2c   :  { %159 = vsyncpa [#allocation3], 1 }
  0x2d   :  { %160 = vsyncpa [#allocation6], 1 }
  0x2e   :  { %161 = vsyncpa [#allocation4], 1 }

</bundles_post_ra>
